<compile_context>
chip_gen: v6e
topology: v6e:2x2x1
jax: 0.10.0
libtpu: 0.0.40
codegen_flags: <defaults>
</compile_context>

<pallas_src>
import jax
import jax.numpy as jnp
from jax.experimental import pallas as pl
from jax.experimental.pallas import tpu as pltpu


def _round_up(v, mult):
    return ((v + mult - 1) // mult) * mult


def _rbm_classifier_kernel(x_ref, wt_ref, b_ref, w1_ref, b1_ref, w2_ref, b2_ref,
                           out_ref):
    """One grid step = S independent sample forwards, stacked along lanes.

    x_ref  : (B,   S*m)  bf16  x of S samples, transposed & lane-concatenated
    wt_ref : (S*m, S*n)  bf16  blockdiag(W^T), resident across the grid
    b_ref  : (1,   S*n)  f32   RBM bias b tiled along lanes
    w1_ref : (hidp, B)   bf16  W1, zero-padded rows to a sublane multiple of 8
    b1_ref : (hidp, 1)   f32
    w2_ref : (clsp, hidp) bf16 W2, zero-padded
    b2_ref : (clsp, 1)   f32
    out_ref: (clsp, S*n) f32   out^T of S samples, lane-concatenated
    """
    # RBM hidden layer for all S samples in one MXU matmul (f32 accumulation).
    pre = jnp.dot(x_ref[...], wt_ref[...], preferred_element_type=jnp.float32)
    h = jax.nn.sigmoid(b_ref[...] + pre).astype(jnp.bfloat16)            # (B, S*n)

    # classifier: Linear(no_h, classes*5) + sigmoid (transposed, flat).
    y1 = jnp.dot(w1_ref[...], h, preferred_element_type=jnp.float32) + b1_ref[...]
    s1 = jax.nn.sigmoid(y1).astype(jnp.bfloat16)                         # (hidp, S*n)

    # classifier2: Linear(classes*5, classes) + sigmoid (transposed, flat).
    y2 = jnp.dot(w2_ref[...], s1, preferred_element_type=jnp.float32) + b2_ref[...]
    out_ref[...] = jax.nn.sigmoid(y2)                                    # (clsp, S*n)


def rbm_classifier_forward(x, W, b, W1, b1, W2, b2, *, samples_per_block=8):
    """Batched RBMClassifier forward.

    x : (N, no_x, B) with B == no_h (column-per-sample RBM convention; the torch
        forward is only shape-valid when the batch axis equals no_h)
    W : (no_h, no_x); b : (no_h, 1)
    W1: (classes*5, no_h); b1: (classes*5,)
    W2: (classes, classes*5); b2: (classes,)
    returns (N, no_h, classes) float32
    """
    N, m, B = x.shape
    n = W.shape[0]
    hid1 = W1.shape[0]
    classes = W2.shape[0]
    assert W.shape == (n, m) and b.shape == (n, 1)
    assert B == W1.shape[1] == n, (
        "torch Linear(no_h, ...) consumes the batch axis: B must equal no_h")
    assert W2.shape[1] == hid1 and b1.shape == (hid1,) and b2.shape == (classes,)

    S = samples_per_block
    n_blocks = pl.cdiv(N, S)
    N_pad = n_blocks * S
    if N_pad != N:
        x = jnp.pad(x, ((0, N_pad - N), (0, 0), (0, 0)))
    if n_blocks > 1:
        # Lane-tiled grid axis: each block's lane extent must be 128-aligned.
        assert (S * n) % 128 == 0 and (S * m) % 128 == 0, (
            "pick samples_per_block so that S*no_h and S*no_x are multiples of 128")

    # Sublane padding of the tiny classifier dims. Zero padding is exact:
    # padded y1 rows are 0 -> s1 rows are 0.5 -> annihilated by the zero columns
    # padded onto W2; padded output rows are sliced off below.
    hid_p = _round_up(hid1, 8)
    cls_p = _round_up(classes, 8)

    # ---- wrapper-side layout plumbing (all XLA, outside the kernel) ----
    # x: (N_pad, m, B) -> (B, N_pad*m); column s*m+k holds x[s, k, :].
    x_cols = jnp.transpose(x, (2, 0, 1)).reshape(B, N_pad * m).astype(jnp.bfloat16)
    # blockdiag(W^T): (S*m, S*n) -> S samples share one flat matmul.
    wt_bd = jnp.kron(jnp.eye(S, dtype=W.dtype), W.T).astype(jnp.bfloat16)
    # RBM bias tiled along the lane axis: (1, S*n).
    b_row = jnp.tile(b.reshape(1, n), (1, S)).astype(jnp.float32)
    w1p = jnp.zeros((hid_p, n), W1.dtype).at[:hid1].set(W1).astype(jnp.bfloat16)
    b1p = jnp.zeros((hid_p, 1), jnp.float32).at[:hid1, 0].set(b1.astype(jnp.float32))
    w2p = (jnp.zeros((cls_p, hid_p), W2.dtype).at[:classes, :hid1].set(W2)
           .astype(jnp.bfloat16))
    b2p = jnp.zeros((cls_p, 1), jnp.float32).at[:classes, 0].set(b2.astype(jnp.float32))

    out_t = pl.pallas_call(
        _rbm_classifier_kernel,
        out_shape=jax.ShapeDtypeStruct((cls_p, N_pad * n), jnp.float32),
        grid_spec=pltpu.PrefetchScalarGridSpec(
            num_scalar_prefetch=0,
            grid=(n_blocks,),
            in_specs=[
                pl.BlockSpec((B, S * m), lambda i: (0, i)),       # per-block x slab
                pl.BlockSpec((S * m, S * n), lambda i: (0, 0)),   # resident weights
                pl.BlockSpec((1, S * n), lambda i: (0, 0)),
                pl.BlockSpec((hid_p, n), lambda i: (0, 0)),
                pl.BlockSpec((hid_p, 1), lambda i: (0, 0)),
                pl.BlockSpec((cls_p, hid_p), lambda i: (0, 0)),
                pl.BlockSpec((cls_p, 1), lambda i: (0, 0)),
            ],
            out_specs=pl.BlockSpec((cls_p, S * n), lambda i: (0, i)),
        ),
        compiler_params=pltpu.CompilerParams(
            dimension_semantics=("parallel",),   # shard sample blocks across TCs
        ),
    )(x_cols, wt_bd, b_row, w1p, b1p, w2p, b2p)

    # (cls_p, N_pad*n) -> (N, no_h, classes)
    out = out_t.reshape(cls_p, N_pad, n).transpose(1, 2, 0)[:N, :, :classes]
    return out


def reference_forward(x, W, b, W1, b1, W2, b2):
    """Pure-JAX f32 reference, per sample (batched over the leading axis)."""
    h = jax.nn.sigmoid(b[None] + jnp.einsum('nm,smb->snb', W, x))
    y1 = h @ W1.T + b1
    s1 = jax.nn.sigmoid(y1)
    y2 = s1 @ W2.T + b2
    return jax.nn.sigmoid(y2)


if __name__ == "__main__":
    # Small shapes consistent with the module:
    #   no_x (m) = 64, no_h (n) = 32, classes = 10 -> classifier hidden = 50.
    #   The per-sample "batch" must equal no_h for the torch forward to be valid.
    no_x, no_h, classes = 64, 32, 10
    batch = no_h
    hid1 = classes * 5
    n_samples = 64          # independent forwards fused into a single pallas_call

    key = jax.random.PRNGKey(0)
    k_x, k_w, k_b, k_w1, k_b1, k_w2, k_b2 = jax.random.split(key, 7)

    x = jax.random.normal(k_x, (n_samples, no_x, batch), dtype=jnp.float32)
    # TODO(synk): the torch module loads pretrained RBM tensors from disk; use
    # deterministic synthetic parameters here instead (no file / network access).
    W = 0.1 * jax.random.normal(k_w, (no_h, no_x), dtype=jnp.float32)
    b = 0.1 * jax.random.normal(k_b, (no_h, 1), dtype=jnp.float32)
    W1 = 0.1 * jax.random.normal(k_w1, (hid1, no_h), dtype=jnp.float32)
    b1 = 0.1 * jax.random.normal(k_b1, (hid1,), dtype=jnp.float32)
    W2 = 0.1 * jax.random.normal(k_w2, (classes, hid1), dtype=jnp.float32)
    b2 = 0.1 * jax.random.normal(k_b2, (classes,), dtype=jnp.float32)

    fwd = jax.jit(rbm_classifier_forward, static_argnames=("samples_per_block",))
    out = fwd(x, W, b, W1, b1, W2, b2, samples_per_block=8)
    out = jax.block_until_ready(out)

    ref = reference_forward(x, W, b, W1, b1, W2, b2)
    assert out.shape == (n_samples, no_h, classes), out.shape
    # bf16 MXU operands with f32 accumulation: expect ~1e-3 agreement vs f32 ref.
    err = float(jnp.max(jnp.abs(out - ref)))
    assert jnp.allclose(out, ref, atol=2e-2, rtol=2e-2), err

    print("KERNEL_OK")
</pallas_src>

<mosaic_0001>
module attributes {stable_mosaic.version = 11 : i64} {
  func.func @_rbm_classifier_kernel(%arg0: i32, %arg1: memref<32x512xbf16, #tpu.memory_space<vmem>>, %arg2: memref<512x256xbf16, #tpu.memory_space<vmem>>, %arg3: memref<1x256xf32, #tpu.memory_space<vmem>>, %arg4: memref<56x32xbf16, #tpu.memory_space<vmem>>, %arg5: memref<56x1xf32, #tpu.memory_space<vmem>>, %arg6: memref<16x56xbf16, #tpu.memory_space<vmem>>, %arg7: memref<16x1xf32, #tpu.memory_space<vmem>>, %arg8: memref<16x256xf32, #tpu.memory_space<vmem>>) attributes {dimension_semantics = [#tpu.dimension_semantics<parallel>], iteration_bounds = array<i64: 8>, scalar_prefetch = 0 : i64, scratch_operands = 0 : i64, tpu.core_type = #tpu.core_type<tc>, window_params = [{transform_indices = @transform_0, window_bounds = array<i64: 32, 512>}, {pipeline_mode = #tpu.pipeline_mode<synchronous>, transform_indices = @transform_1, window_bounds = array<i64: 512, 256>}, {pipeline_mode = #tpu.pipeline_mode<synchronous>, transform_indices = @transform_2, window_bounds = array<i64: 1, 256>}, {pipeline_mode = #tpu.pipeline_mode<synchronous>, transform_indices = @transform_3, window_bounds = array<i64: 56, 32>}, {pipeline_mode = #tpu.pipeline_mode<synchronous>, transform_indices = @transform_4, window_bounds = array<i64: 56, 1>}, {pipeline_mode = #tpu.pipeline_mode<synchronous>, transform_indices = @transform_5, window_bounds = array<i64: 16, 56>}, {pipeline_mode = #tpu.pipeline_mode<synchronous>, transform_indices = @transform_6, window_bounds = array<i64: 16, 1>}, {transform_indices = @transform_7, window_bounds = array<i64: 16, 256>}]} {
    %c0 = arith.constant 0 : index
    %c0_0 = arith.constant 0 : index
    %0 = vector.load %arg1[%c0, %c0_0] : memref<32x512xbf16, #tpu.memory_space<vmem>>, vector<32x512xbf16>
    %c0_1 = arith.constant 0 : index
    %c0_2 = arith.constant 0 : index
    %1 = vector.load %arg2[%c0_1, %c0_2] : memref<512x256xbf16, #tpu.memory_space<vmem>>, vector<512x256xbf16>
    %cst = arith.constant dense<0.000000e+00> : vector<32x256xf32>
    %2 = tpu.matmul %0, %1, %cst {dimension_numbers = #tpu.dot_dimension_numbers<[1], [0], [0], [1], [0, 0, 1, 1], [], []>} : vector<32x512xbf16>, vector<512x256xbf16>, vector<32x256xf32> -> vector<32x256xf32>
    %c0_3 = arith.constant 0 : index
    %c0_4 = arith.constant 0 : index
    %3 = vector.load %arg3[%c0_3, %c0_4] : memref<1x256xf32, #tpu.memory_space<vmem>>, vector<1x256xf32>
    %4 = vector.broadcast %3 : vector<1x256xf32> to vector<32x256xf32>
    %5 = arith.addf %4, %2 : vector<32x256xf32>
    %6 = arith.negf %5 : vector<32x256xf32>
    %7 = math.exp %6 : vector<32x256xf32>
    %cst_5 = arith.constant 1.000000e+00 : f32
    %8 = vector.broadcast %cst_5 : f32 to vector<32x256xf32>
    %9 = arith.addf %8, %7 : vector<32x256xf32>
    %10 = arith.divf %8, %9 : vector<32x256xf32>
    %11 = arith.truncf %10 : vector<32x256xf32> to vector<32x256xbf16>
    %c0_6 = arith.constant 0 : index
    %c0_7 = arith.constant 0 : index
    %12 = vector.load %arg4[%c0_6, %c0_7] : memref<56x32xbf16, #tpu.memory_space<vmem>>, vector<56x32xbf16>
    %cst_8 = arith.constant dense<0.000000e+00> : vector<56x256xf32>
    %13 = tpu.matmul %12, %11, %cst_8 {dimension_numbers = #tpu.dot_dimension_numbers<[1], [0], [0], [1], [0, 0, 1, 1], [], []>} : vector<56x32xbf16>, vector<32x256xbf16>, vector<56x256xf32> -> vector<56x256xf32>
    %c0_9 = arith.constant 0 : index
    %c0_10 = arith.constant 0 : index
    %14 = vector.load %arg5[%c0_9, %c0_10] : memref<56x1xf32, #tpu.memory_space<vmem>>, vector<56x1xf32>
    %15 = vector.broadcast %14 : vector<56x1xf32> to vector<56x256xf32>
    %16 = arith.addf %13, %15 : vector<56x256xf32>
    %17 = arith.negf %16 : vector<56x256xf32>
    %18 = math.exp %17 : vector<56x256xf32>
    %cst_11 = arith.constant 1.000000e+00 : f32
    %19 = vector.broadcast %cst_11 : f32 to vector<56x256xf32>
    %20 = arith.addf %19, %18 : vector<56x256xf32>
    %21 = arith.divf %19, %20 : vector<56x256xf32>
    %22 = arith.truncf %21 : vector<56x256xf32> to vector<56x256xbf16>
    %c0_12 = arith.constant 0 : index
    %c0_13 = arith.constant 0 : index
    %23 = vector.load %arg6[%c0_12, %c0_13] : memref<16x56xbf16, #tpu.memory_space<vmem>>, vector<16x56xbf16>
    %cst_14 = arith.constant dense<0.000000e+00> : vector<16x256xf32>
    %24 = tpu.matmul %23, %22, %cst_14 {dimension_numbers = #tpu.dot_dimension_numbers<[1], [0], [0], [1], [0, 0, 1, 1], [], []>} : vector<16x56xbf16>, vector<56x256xbf16>, vector<16x256xf32> -> vector<16x256xf32>
    %c0_15 = arith.constant 0 : index
    %c0_16 = arith.constant 0 : index
    %25 = vector.load %arg7[%c0_15, %c0_16] : memref<16x1xf32, #tpu.memory_space<vmem>>, vector<16x1xf32>
    %26 = vector.broadcast %25 : vector<16x1xf32> to vector<16x256xf32>
    %27 = arith.addf %24, %26 : vector<16x256xf32>
    %28 = arith.negf %27 : vector<16x256xf32>
    %29 = math.exp %28 : vector<16x256xf32>
    %cst_17 = arith.constant 1.000000e+00 : f32
    %30 = vector.broadcast %cst_17 : f32 to vector<16x256xf32>
    %31 = arith.addf %30, %29 : vector<16x256xf32>
    %32 = arith.divf %30, %31 : vector<16x256xf32>
    %c0_18 = arith.constant 0 : index
    %c0_19 = arith.constant 0 : index
    %33 = vector.load %arg8[%c0_18, %c0_19] : memref<16x256xf32, #tpu.memory_space<vmem>>, vector<16x256xf32>
    tpu.vector_store %arg8[%c0_18, %c0_19], %32 {strides = array<i32>} : memref<16x256xf32, #tpu.memory_space<vmem>>, vector<16x256xf32>,
    return
  }
  func.func @transform_0(%arg0: i32) -> (i32, i32) {
    %c0_i32 = arith.constant 0 : i32
    %c0_i32_0 = arith.constant 0 : i32
    return %c0_i32, %arg0 : i32, i32
  }
  func.func @transform_1(%arg0: i32) -> (i32, i32) {
    %c0_i32 = arith.constant 0 : i32
    %c0_i32_0 = arith.constant 0 : i32
    %c0_i32_1 = arith.constant 0 : i32
    return %c0_i32, %c0_i32_0 : i32, i32
  }
  func.func @transform_2(%arg0: i32) -> (i32, i32) {
    %c0_i32 = arith.constant 0 : i32
    %c0_i32_0 = arith.constant 0 : i32
    %c0_i32_1 = arith.constant 0 : i32
    return %c0_i32, %c0_i32_0 : i32, i32
  }
  func.func @transform_3(%arg0: i32) -> (i32, i32) {
    %c0_i32 = arith.constant 0 : i32
    %c0_i32_0 = arith.constant 0 : i32
    %c0_i32_1 = arith.constant 0 : i32
    return %c0_i32, %c0_i32_0 : i32, i32
  }
  func.func @transform_4(%arg0: i32) -> (i32, i32) {
    %c0_i32 = arith.constant 0 : i32
    %c0_i32_0 = arith.constant 0 : i32
    %c0_i32_1 = arith.constant 0 : i32
    return %c0_i32, %c0_i32_0 : i32, i32
  }
  func.func @transform_5(%arg0: i32) -> (i32, i32) {
    %c0_i32 = arith.constant 0 : i32
    %c0_i32_0 = arith.constant 0 : i32
    %c0_i32_1 = arith.constant 0 : i32
    return %c0_i32, %c0_i32_0 : i32, i32
  }
  func.func @transform_6(%arg0: i32) -> (i32, i32) {
    %c0_i32 = arith.constant 0 : i32
    %c0_i32_0 = arith.constant 0 : i32
    %c0_i32_1 = arith.constant 0 : i32
    return %c0_i32, %c0_i32_0 : i32, i32
  }
  func.func @transform_7(%arg0: i32) -> (i32, i32) {
    %c0_i32 = arith.constant 0 : i32
    %c0_i32_0 = arith.constant 0 : i32
    return %c0_i32, %arg0 : i32, i32
  }
}

</mosaic_0001>

<bundles_post_ra>
// kernel: rbm_classifier_forward.1
= control target key start
LH: loop header
LB: loop body
LE: loop exit
PB: predicated region body
PF: predicated region fallthrough
CT: control target
= control target key end

     0   :  { %s1788_s24 = smov 0   ;;  %s1790_s25 = smov 0   ;;  %s2106_s0 = inlined_call_operand.vmem [shape: bf16[32,4096], index: 0, kind: input, shape index: {}]   ;;  %s2107_s1 = inlined_call_operand.vmem [shape: bf16[512,256], index: 1, kind: input, shape index: {}]   ;;  %s2108_s2 = inlined_call_operand.vmem [shape: f32[1,256], index: 2, kind: input, shape index: {}]   ;;  %s2109_s3 = inlined_call_operand.vmem [shape: bf16[56,32], index: 3, kind: input, shape index: {}]   ;;  %s2110_s4 = inlined_call_operand.vmem [shape: f32[56,1], index: 4, kind: input, shape index: {}]   ;;  %s2111_s5 = inlined_call_operand.vmem [shape: bf16[16,56], index: 5, kind: input, shape index: {}]   ;;  %s2112_s6 = inlined_call_operand.vmem [shape: f32[16,1], index: 6, kind: input, shape index: {}]   ;;  %s2113_s7 = inlined_call_operand.vmem [shape: f32[16,2048], index: 7, kind: output, shape index: {}]  }
   0x1   :  { %s1792_s26 = smov 0  }
   0x2 LB: > { %s1353_s27 = sadd.s32 4294967295, %s1745_s26   ;;  %s1805_s28 = sadd.s32 1, %s1745_s26   ;;  %s1745_s26 = sphi %s1792_s26, %s2117_s26   ;;  %s1741_s25 = sphi %s1790_s25, %s2116_s25   ;;  %s1737_s24 = sphi %s1788_s24, %s2115_s24  }
   0x3   : > { %s21_s29 = ssub.s32 %s1745_s26, %s1805_s28  ;;  %s24_s30 = sadd.s32 1, %s1741_s25 }
   0x4   : > { %p22_p0 = scmp.eq.s32.totalorder %s21_s29, 0  ;;  %p31_p1 = scmp.ne.s32.totalorder %s1741_s25, %s1737_s24 }
   0x5   : > { %p32_p2 = scmp.eq.s32.totalorder %s1745_s26, 0  ;;  %p187_p3 = scmp.eq.s32.totalorder %s1353_s27, 7 }
   0x6   : > { %s1816_s8 = scalar_select %p22_p0, %s1741_s25, %s24_s30  }
   0x7   : > { %p33_p4 = por %p32_p2, %p31_p1  ;;  %p1818_p5 = por %p187_p3, %p31_p1 }
   0x8   : > { %p1356_p6 = scmp.ge.s32.totalorder %s1745_s26, 8 }
   0xa   : > { %227 = sbr.rel (%p1356_p6) target bundleno = 23 (0x17), region = 40 }
   0xf   : > { %230 = sbr.rel (!%p33_p4) target bundleno = 23 (0x17), region = 44  ;;  %s232_s10 = sand.u32 (%p33_p4), 1, %s1741_s25  }
  0x10   : > { %s1477_s11 = sshll.u32 (%p33_p4), %s1745_s26, 4  ;;  %s1357_s12 = sshll.u32 (%p33_p4), %s232_s10, 6 }
  0x11   : > { %s237_s15 = scalar_lea.vmem (%p33_p4), %s2106_s0, %s1477_s11  ;;  %s234_s16 = scalar_lea.vmem (%p33_p4), [#allocation2], %s1357_s12 }
  0x12   : > { %v250_v0 = vld [vmem:[%s237_s15] sm:$0xff] (%p33_p4)  ;;  %v252_v1 = vld [vmem:[%s237_s15 + $0x8] sm:$0xff] (%p33_p4) }
  0x13   : > { %v254_v2 = vld [vmem:[%s237_s15 + $0x80] sm:$0xff] (%p33_p4)  ;;  %251 = vst [vmem:[%s234_s16] sm:$0xff] (%p33_p4), %v250_v0  ;;  %253 = vst [vmem:[%s234_s16 + $0x8] sm:$0xff] (%p33_p4), %v252_v1  ;;  %v256_v3 = vld [vmem:[%s237_s15 + $0x88] sm:$0xff] (%p33_p4) }
  0x14   : > { %255 = vst [vmem:[%s234_s16 + $0x10] sm:$0xff] %v254_v2  ;;  %v258_v4 = vld [vmem:[%s237_s15 + $0x100] sm:$0xff]  ;;  %v260_v5 = vld [vmem:[%s237_s15 + $0x108] sm:$0xff]  ;;  %257 = vst [vmem:[%s234_s16 + $0x18] sm:$0xff] %v256_v3 }
  0x15   : > { %259 = vst [vmem:[%s234_s16 + $0x20] sm:$0xff] %v258_v4  ;;  %261 = vst [vmem:[%s234_s16 + $0x28] sm:$0xff] %v260_v5  ;;  %v262_v6 = vld [vmem:[%s237_s15 + $0x180] sm:$0xff]  ;;  %v264_v7 = vld [vmem:[%s237_s15 + $0x188] sm:$0xff] }
  0x16   : > { %263 = vst [vmem:[%s234_s16 + $0x30] sm:$0xff] %v262_v6  ;;  %265 = vst [vmem:[%s234_s16 + $0x38] sm:$0xff] %v264_v7 }
  0x17 PF: > { %p1360_p7 = scmp.ge.s32.totalorder %s1745_s26, 1  ;;  %p270_p8 = scmp.lt.s32.totalorder %s1745_s26, 9 }
  0x19   : > { %p271_p9 = pnand %p1360_p7, %p270_p8 }
  0x1a   : > { %s277_s13 = sand.u32 (!%p271_p9), 1, %s1737_s24  }
  0x1b   : > { %274 = sbr.rel (%p271_p9) target bundleno = 864 (0x360), region = 67  ;;  %s1361_s22 = sshll.u32 (!%p271_p9), %s277_s13, 6 }
  0x1c   : > { %s1977_s20 = scalar_lea.vmem (!%p271_p9), [#allocation2], %s1361_s22  ;;  %s1362_s10 = sshll.u32 (!%p271_p9), %s277_s13, 5 }
  0x1d   : > { %s306_s11 = scalar_lea.vmem (!%p271_p9), [#allocation3], %s1362_s10 }
  0x20   : > { %v1506_v8 = vld [vmem:[%s2107_s1 + $0x74] ss:$8 sps:$4 sm:$0xff]   ;;  %v1510_v10 = vld [vmem:[%s2107_s1 + $0x70] ss:$8 sps:$4 sm:$0xff]   ;;  %v1512_v12 = vld [vmem:[%s2107_s1 + $0x64] ss:$8 sps:$4 sm:$0xff]  }
  0x21   : > { %v1508_v9 = vld [vmem:[%s2107_s1 + $0x174] ss:$8 sps:$4 sm:$0xff]   ;;  %742 = vmatprep.subr.bf16.mxu0 %v1506_v8  ;;  %v1511_v11 = vld [vmem:[%s2107_s1 + $0x170] ss:$8 sps:$4 sm:$0xff]   ;;  %v1514_v13 = vld [vmem:[%s2107_s1 + $0x164] ss:$8 sps:$4 sm:$0xff]  }
  0x22   : > { %795 = vmatprep.subr.bf16.mxu1 %v1508_v9  ;;  %743 = vmatpush1.bf16.msra.mxu0 %v1510_v10  ;;  %v1516_v14 = vld [vmem:[%s2107_s1 + $0x60] ss:$8 sps:$4 sm:$0xff]   ;;  %v1518_v16 = vld [vmem:[%s2107_s1 + $0x54] ss:$8 sps:$4 sm:$0xff]   ;;  %v1522_v18 = vld [vmem:[%s2107_s1 + $0x50] ss:$8 sps:$4 sm:$0xff]  }
  0x23   : > { %796 = vmatpush1.bf16.msra.mxu1 %v1511_v11  ;;  %744 = vmatprep.subr.bf16.mxu0 %v1512_v12  ;;  %v1517_v15 = vld [vmem:[%s2107_s1 + $0x160] ss:$8 sps:$4 sm:$0xff]   ;;  %v1520_v17 = vld [vmem:[%s2107_s1 + $0x154] ss:$8 sps:$4 sm:$0xff]   ;;  %v1523_v19 = vld [vmem:[%s2107_s1 + $0x150] ss:$8 sps:$4 sm:$0xff]  }
  0x24   : > { %797 = vmatprep.subr.bf16.mxu1 %v1514_v13  ;;  %v1524_v20 = vld [vmem:[%s2107_s1 + $0x44] ss:$8 sps:$4 sm:$0xff]   ;;  %v1528_v22 = vld [vmem:[%s2107_s1 + $0x40] ss:$8 sps:$4 sm:$0xff]   ;;  %v1530_v24 = vld [vmem:[%s2107_s1 + $0x34] ss:$8 sps:$4 sm:$0xff]  }
  0x25   : > { %v1526_v21 = vld [vmem:[%s2107_s1 + $0x144] ss:$8 sps:$4 sm:$0xff]   ;;  %v1529_v23 = vld [vmem:[%s2107_s1 + $0x140] ss:$8 sps:$4 sm:$0xff]   ;;  %v1532_v25 = vld [vmem:[%s2107_s1 + $0x134] ss:$8 sps:$4 sm:$0xff]  }
  0x26   : > { %745 = vmatpush1.bf16.msra.mxu0 %v1516_v14  ;;  %v1534_v26 = vld [vmem:[%s2107_s1 + $0x30] ss:$8 sps:$4 sm:$0xff]   ;;  %v1536_v28 = vld [vmem:[%s2107_s1 + $0x24] ss:$8 sps:$4 sm:$0xff]   ;;  %v1540_v30 = vld [vmem:[%s2107_s1 + $0x20] ss:$8 sps:$4 sm:$0xff]  }
  0x27   : > { %798 = vmatpush1.bf16.msra.mxu1 %v1517_v15  ;;  %746 = vmatprep.subr.bf16.mxu0 %v1518_v16  ;;  %v1535_v27 = vld [vmem:[%s2107_s1 + $0x130] ss:$8 sps:$4 sm:$0xff]   ;;  %v1538_v29 = vld [vmem:[%s2107_s1 + $0x124] ss:$8 sps:$4 sm:$0xff]   ;;  %v1541_v31 = vld [vmem:[%s2107_s1 + $0x120] ss:$8 sps:$4 sm:$0xff]  }
  0x28   : > { %799 = vmatprep.subr.bf16.mxu1 %v1520_v17  ;;  %v1542_v32 = vld [vmem:[%s2107_s1 + $0x14] ss:$8 sps:$4 sm:$0xff]   ;;  %v1546_v34 = vld [vmem:[%s2107_s1 + $0x10] ss:$8 sps:$4 sm:$0xff]   ;;  %v1548_v36 = vld [vmem:[%s2107_s1 + $0x4] ss:$8 sps:$4 sm:$0xff]  }
  0x29   : > { %v1544_v33 = vld [vmem:[%s2107_s1 + $0x114] ss:$8 sps:$4 sm:$0xff]   ;;  %v1547_v35 = vld [vmem:[%s2107_s1 + $0x110] ss:$8 sps:$4 sm:$0xff]   ;;  %v1550_v37 = vld [vmem:[%s2107_s1 + $0x104] ss:$8 sps:$4 sm:$0xff]  }
  0x2a   : > { %747 = vmatpush1.bf16.msra.mxu0 %v1522_v18  ;;  %v1552_v38 = vld [vmem:[%s2107_s1] ss:$8 sps:$4 sm:$0xff]   ;;  %v1554_v40 = vld [vmem:[%s2107_s1 + $0xf4] ss:$8 sps:$4 sm:$0xff]   ;;  %v1558_v42 = vld [vmem:[%s2107_s1 + $0xf0] ss:$8 sps:$4 sm:$0xff]  }
  0x2b   : > { %800 = vmatpush1.bf16.msra.mxu1 %v1523_v19  ;;  %748 = vmatprep.subr.bf16.mxu0 %v1524_v20  ;;  %v1553_v39 = vld [vmem:[%s2107_s1 + $0x100] ss:$8 sps:$4 sm:$0xff]   ;;  %v1556_v41 = vld [vmem:[%s2107_s1 + $0x1f4] ss:$8 sps:$4 sm:$0xff]   ;;  %v1559_v43 = vld [vmem:[%s2107_s1 + $0x1f0] ss:$8 sps:$4 sm:$0xff]  }
  0x2c   : > { %801 = vmatprep.subr.bf16.mxu1 %v1526_v21  ;;  %v1560_v44 = vld [vmem:[%s2107_s1 + $0xe4] ss:$8 sps:$4 sm:$0xff]   ;;  %v1564_v46 = vld [vmem:[%s2107_s1 + $0xe0] ss:$8 sps:$4 sm:$0xff]   ;;  %v1566_v48 = vld [vmem:[%s2107_s1 + $0xd4] ss:$8 sps:$4 sm:$0xff]  }
  0x2d   : > { %v1562_v45 = vld [vmem:[%s2107_s1 + $0x1e4] ss:$8 sps:$4 sm:$0xff]   ;;  %v1565_v47 = vld [vmem:[%s2107_s1 + $0x1e0] ss:$8 sps:$4 sm:$0xff]   ;;  %v1568_v49 = vld [vmem:[%s2107_s1 + $0x1d4] ss:$8 sps:$4 sm:$0xff]  }
  0x2e   : > { %749 = vmatpush1.bf16.msra.mxu0 %v1528_v22  ;;  %v1570_v50 = vld [vmem:[%s2107_s1 + $0xd0] ss:$8 sps:$4 sm:$0xff]   ;;  %v1572_v52 = vld [vmem:[%s2107_s1 + $0xc4] ss:$8 sps:$4 sm:$0xff]   ;;  %v1576_v54 = vld [vmem:[%s2107_s1 + $0xc0] ss:$8 sps:$4 sm:$0xff]  }
  0x2f   : > { %802 = vmatpush1.bf16.msra.mxu1 %v1529_v23  ;;  %750 = vmatprep.subr.bf16.mxu0 %v1530_v24  ;;  %v1571_v51 = vld [vmem:[%s2107_s1 + $0x1d0] ss:$8 sps:$4 sm:$0xff]   ;;  %v1574_v53 = vld [vmem:[%s2107_s1 + $0x1c4] ss:$8 sps:$4 sm:$0xff]   ;;  %v1577_v55 = vld [vmem:[%s2107_s1 + $0x1c0] ss:$8 sps:$4 sm:$0xff]  }
  0x30   : > { %803 = vmatprep.subr.bf16.mxu1 %v1532_v25  ;;  %v1578_v56 = vld [vmem:[%s2107_s1 + $0xb4] ss:$8 sps:$4 sm:$0xff]   ;;  %v1582_v60 = vld [vmem:[%s2107_s1 + $0xb0] ss:$8 sps:$4 sm:$0xff]   ;;  %v1584_v62 = vld [vmem:[%s2107_s1 + $0xa4] ss:$8 sps:$4 sm:$0xff]  }
  0x31   : > { %v1604_v57 = vld [vmem:[%s1977_s20 + $0x4] ss:$16 sps:$4 sm:$0xff]   ;;  %v1607_v59 = vld [vmem:[%s1977_s20 + $0xc] ss:$16 sps:$4 sm:$0xff]   ;;  %v1583_v61 = vld [vmem:[%s2107_s1 + $0x1b0] ss:$8 sps:$4 sm:$0xff]  }
  0x32   : > { %751 = vmatpush1.bf16.msra.mxu0 %v1534_v26  ;;  %v1580_v58 = vld [vmem:[%s2107_s1 + $0x1b4] ss:$8 sps:$4 sm:$0xff]   ;;  %774 = vmatprep.mubr.bf16.mxu0 %v1604_v57  ;;  %v1586_v63 = vld [vmem:[%s2107_s1 + $0x1a4] ss:$8 sps:$4 sm:$0xff]   ;;  %v1588_v0 = vld [vmem:[%s2107_s1 + $0xa0] ss:$8 sps:$4 sm:$0xff]   ;;  %v850_v26 = vlaneseq }
  0x33   : > { %804 = vmatpush1.bf16.msra.mxu1 %v1535_v27  ;;  %752 = vmatprep.subr.bf16.mxu0 %v1536_v28  ;;  %v1589_v1 = vld [vmem:[%s2107_s1 + $0x1a0] ss:$8 sps:$4 sm:$0xff]   ;;  %v1590_v2 = vld [vmem:[%s2107_s1 + $0x94] ss:$8 sps:$4 sm:$0xff]   ;;  %v1594_v4 = vld [vmem:[%s2107_s1 + $0x90] ss:$8 sps:$4 sm:$0xff]  }
  0x34   : > { %805 = vmatprep.subr.bf16.mxu1 %v1538_v29  ;;  %827 = vmatprep.mubr.bf16.mxu1 %v1607_v59  ;;  %v1592_v3 = vld [vmem:[%s2107_s1 + $0x194] ss:$8 sps:$4 sm:$0xff]   ;;  %v1595_v5 = vld [vmem:[%s2107_s1 + $0x190] ss:$8 sps:$4 sm:$0xff]   ;;  %v1596_v6 = vld [vmem:[%s2107_s1 + $0x84] ss:$8 sps:$4 sm:$0xff]  }
  0x35   : > { %v1598_v7 = vld [vmem:[%s2107_s1 + $0x184] ss:$8 sps:$4 sm:$0xff]   ;;  %v1600_v8 = vld [vmem:[%s2107_s1 + $0x80] ss:$8 sps:$4 sm:$0xff]   ;;  %v1747_v16 = vmov 0   ;;  %v933_v17 = vld [vmem:[%s2110_s4 + $0x30] sm:$0xff] }
  0x36   : > { %753 = vmatpush1.bf16.msra.mxu0 %v1540_v30  ;;  %v1601_v9 = vld [vmem:[%s2107_s1 + $0x180] ss:$8 sps:$4 sm:$0xff]   ;;  %v1608_v12 = vld [vmem:[%s1977_s20 + $0x24] ss:$16 sps:$4 sm:$0xff]   ;;  %v1610_v13 = vld [vmem:[%s1977_s20 + $0x2c] ss:$16 sps:$4 sm:$0xff]   ;;  %1504 = vset.pattern.permute.xlu0 %v1747_v16 }
  0x37   : > { %806 = vmatpush1.bf16.msra.mxu1 %v1541_v31  ;;  %754 = vmatprep.subr.bf16.mxu0 %v1542_v32  ;;  %v1602_v10 = vld [vmem:[%s1977_s20] ss:$16 sps:$4 sm:$0xff]   ;;  %v1605_v11 = vld [vmem:[%s1977_s20 + $0x8] ss:$16 sps:$4 sm:$0xff]   ;;  %v851_v27 = vshrl.u32 %v850_v26, 7  ;;  %vm987_vm0 = vcmask 261120  }
  0x38   : > { %807 = vmatprep.subr.bf16.mxu1 %v1544_v33  ;;  %v1612_v14 = vld [vmem:[%s1977_s20 + $0x20] ss:$16 sps:$4 sm:$0xff]   ;;  %v1613_v15 = vld [vmem:[%s1977_s20 + $0x28] ss:$16 sps:$4 sm:$0xff]   ;;  %1505 = vset.pattern.permute.xlu1 %v1747_v16  ;;  %vm1186_vm1 = vcmask 1043456   ;;  %vm1182_vm2 = vcmask 457728  }
  0x39   : > { %v932_v18 = vld [vmem:[%s2110_s4 + $0x28] sm:$0xff]  ;;  %966 = vperm.xlu0 %1504, %v933_v17   ;;  %v931_v19 = vld [vmem:[%s2110_s4 + $0x20] sm:$0xff]  ;;  %v929_v20 = vld [vmem:[%s2110_s4 + $0x10] sm:$0xff]  ;;  %v856_v30 = vsub.s32 1, %v851_v27  ;;  %s1478_s22 = sshll.u32 (%p1818_p5), %s1353_s27, 4 }
  0x3a   : > { %755 = vmatpush1.bf16.msra.mxu0 %v1546_v34  ;;  %961 = vperm.xlu1 %1505, %v932_v18   ;;  %v930_v21 = vld [vmem:[%s2110_s4 + $0x18] sm:$0xff]  ;;  %v927_v22 = vld [vmem:[%s2110_s4] sm:$0xff]  ;;  %v928_v23 = vld [vmem:[%s2110_s4 + $0x8] sm:$0xff]  ;;  %s1273_s12 = scalar_lea.vmem (%p1818_p5), %s2113_s7, %s1478_s22 }
  0x3b   : > { %808 = vmatpush1.bf16.msra.mxu1 %v1547_v35  ;;  %756 = vmatprep.subr.bf16.mxu0 %v1548_v36  ;;  %v1165_v24 = vld [vmem:[%s2112_s6] sm:$0xff]  ;;  %v1166_v25 = vld [vmem:[%s2112_s6 + $0x8] sm:$0xff] }
  0x3c   : > { %809 = vmatprep.subr.bf16.mxu1 %v1550_v37  ;;  %v848_v33 = vld [vmem:[%s2108_s2] sm:$0x3] }
  0x3d   : > { %956 = vperm.xlu0 %1504, %v931_v19   ;;  %v857_v35 = vrot.slane %v848_v33, %v856_v30 }
  0x3e   : > { %757 = vmatpush1.bf16.msra.mxu0 %v1552_v38  ;;  %946 = vperm.xlu1 %1505, %v929_v20   ;;  %v852_v38 = vsub.s32 0, %v851_v27 }
  0x3f   : > { %810 = vmatpush1.bf16.msra.mxu1 %v1553_v39  ;;  %758 = vmatprep.subr.bf16.mxu0 %v1554_v40 }
  0x40   : > { %811 = vmatprep.subr.bf16.mxu1 %v1556_v41 }
  0x41   : > { %951 = vperm.xlu0 %1504, %v930_v21  }
  0x42   : > { %759 = vmatpush2.bf16.msra.mxu0 %v1558_v42  ;;  %936 = vperm.xlu1 %1505, %v927_v22  }
  0x43   : > { %812 = vmatpush2.bf16.msra.mxu1 %v1559_v43  ;;  %760 = vmatprep.subr.bf16.mxu0 %v1560_v44 }
  0x44   : > { %813 = vmatprep.subr.bf16.mxu1 %v1562_v45 }
  0x45   : > { %941 = vperm.xlu0 %1504, %v928_v23  }
  0x46   : > { %761 = vmatpush2.bf16.msra.mxu0 %v1564_v46  ;;  %1169 = vperm.xlu1 %1505, %v1165_v24   ;;  %v853_v46 = vrot.slane %v848_v33, %v852_v38  ;;  %v1614_v38 = vld [vmem:[%s2109_s3] sm:$0xff]  }
  0x47   : > { %814 = vmatpush2.bf16.msra.mxu1 %v1565_v47  ;;  %762 = vmatprep.subr.bf16.mxu0 %v1566_v48 }
  0x48   : > { %815 = vmatprep.subr.bf16.mxu1 %v1568_v49 }
  0x49   : > { %1174 = vperm.xlu0 %1504, %v1166_v25  }
  0x4a   : > { %763 = vmatpush2.bf16.msra.mxu0 %v1570_v50 }
  0x4b   : > { %816 = vmatpush2.bf16.msra.mxu1 %v1571_v51  ;;  %764 = vmatprep.subr.bf16.mxu0 %v1572_v52 }
  0x4c   : > { %817 = vmatprep.subr.bf16.mxu1 %v1574_v53 }
  0x4e   : > { %765 = vmatpush2.bf16.msra.mxu0 %v1576_v54 }
  0x4f   : > { %818 = vmatpush2.bf16.msra.mxu1 %v1577_v55  ;;  %766 = vmatprep.subr.bf16.mxu0 %v1578_v56 }
  0x50   : > { %819 = vmatprep.subr.bf16.mxu1 %v1580_v58 }
  0x52   : > { %767 = vmatpush2.bf16.msra.mxu0 %v1582_v60 }
  0x53   : > { %820 = vmatpush2.bf16.msra.mxu1 %v1583_v61  ;;  %768 = vmatprep.subr.bf16.mxu0 %v1584_v62 }
  0x54   : > { %821 = vmatprep.subr.bf16.mxu1 %v1586_v63 }
  0x56   : > { %769 = vmatpush2.bf16.msra.mxu0 %v1588_v0 }
  0x57   : > { %822 = vmatpush2.bf16.msra.mxu1 %v1589_v1  ;;  %770 = vmatprep.subr.bf16.mxu0 %v1590_v2 }
  0x58   : > { %823 = vmatprep.subr.bf16.mxu1 %v1592_v3 }
  0x5a   : > { %771 = vmatpush2.bf16.msra.mxu0 %v1594_v4 }
  0x5b   : > { %824 = vmatpush2.bf16.msra.mxu1 %v1595_v5  ;;  %772 = vmatprep.subr.bf16.mxu0 %v1596_v6 }
  0x5c   : > { %825 = vmatprep.subr.bf16.mxu1 %v1598_v7 }
  0x5e   : > { %773 = vmatpush2.bf16.msra.mxu0 %v1600_v8 }
  0x5f   : > { %826 = vmatpush2.bf16.msra.mxu1 %v1601_v9 }
  0x61   : > { %775 = vmatmul.mubr.bf16.vlgmr.msra.gmra.mxu0 %v1602_v10 }
  0x62   : > { %828 = vmatmul.mubr.bf16.vlgmr.msra.gmra.mxu1 %v1605_v11  ;;  %784 = vmatprep.mubr.bf16.mxu0 %v1608_v12 }
  0x63   : > { %837 = vmatprep.mubr.bf16.mxu1 %v1610_v13 }
  0x69   : > { %785 = vmatmul.mubr.bf16.gmra.mxu0 %v1612_v14 }
  0x6a   : > { %838 = vmatmul.mubr.bf16.gmra.mxu1 %v1613_v15  ;;  %1032 = vmatprep.mubr.bf16.mxu0 %v1747_v16 }
  0x6b   : > { %1225 = vmatprep.mubr.bf16.mxu1 %v1747_v16 }
 0x121   : > { %v776_v28 = vpop.f32.mrf.mxu0 }
 0x122   : > { %v829_v29 = vpop.f32.mrf.mxu1 }
 0x123   : > { %v778_v31 = vpop.f32.mrf.mxu0  ;;  %v830_v49 = vadd.f32 %v829_v29, %v776_v28 }
 0x124   : > { %v831_v32 = vpop.f32.mrf.mxu1 }
 0x125   : > { %v832_v34 = vadd.f32 %v831_v32, %v778_v31  ;;  %v780_v36 = vpop.f32.mrf.mxu0  ;;  %v860_v61 = vadd.f32 %v853_v46, %v830_v49 }
 0x126   : > { %v833_v37 = vpop.f32.mrf.mxu1 }
 0x127   : > { %v782_v39 = vpop.f32.mrf.mxu0  ;;  %v861_v42 = vadd.f32 %v857_v35, %v832_v34  ;;  %v834_v43 = vadd.f32 %v833_v37, %v780_v36  ;;  %v1435_v7 = vmul.f32 -1.442695, %v860_v61 }
 0x128   : > { %v835_v40 = vpop.f32.mrf.mxu1 }
 0x129   : > { %v836_v41 = vadd.f32 %v835_v40, %v782_v39  ;;  %v786_v44 = vpop.f32.mrf.mxu0  ;;  %v1436_v55 = vmul.f32 -1.442695, %v861_v42  ;;  %v862_v56 = vadd.f32 %v853_v46, %v834_v43  ;;  %v1615_v39 = vld [vmem:[%s2109_s3 + $0x8] sm:$0xff]   ;;  %v1616_v40 = vld [vmem:[%s2109_s3 + $0x10] sm:$0xff]  }
 0x12a   : > { %v839_v45 = vpop.f32.mrf.mxu1 }
 0x12b   : > { %v863_v47 = vadd.f32 %v857_v35, %v836_v41  ;;  %v840_v48 = vadd.f32 %v839_v45, %v786_v44  ;;  %v788_v50 = vpop.f32.mrf.mxu0  ;;  %v1437_v4 = vmul.f32 -1.442695, %v862_v56  ;;  %v1617_v41 = vld [vmem:[%s2109_s3 + $0x18] ss:$0 sps:$4 sm:$0xff]   ;;  %v967_v45 = vpop.permute.xlu0 %966 }
 0x12c   : > { %v841_v51 = vpop.f32.mrf.mxu1 }
 0x12d   : > { %v1438_v52 = vmul.f32 -1.442695, %v863_v47  ;;  %v864_v53 = vadd.f32 %v853_v46, %v840_v48  ;;  %v842_v54 = vadd.f32 %v841_v51, %v788_v50  ;;  %v790_v57 = vpop.f32.mrf.mxu0 }
 0x12e   : > { %v843_v58 = vpop.f32.mrf.mxu1 }
 0x12f   : > { %v865_v59 = vadd.f32 %v857_v35, %v842_v54  ;;  %v844_v60 = vadd.f32 %v843_v58, %v790_v57  ;;  %1619 = vpow2.f32 %v1438_v52  ;;  %v1439_v62 = vmul.f32 -1.442695, %v864_v53  ;;  %v792_v63 = vpop.f32.mrf.mxu0  ;;  %v957_v49 = vpop.permute.xlu0 %956 }
 0x130   : > { %v845_v0 = vpop.f32.mrf.mxu1  ;;  %1621 = vpow2.f32 %v1436_v55  ;;  %v962_v53 = vpop.permute.xlu1 %961 }
 0x131   : > { %v1440_v1 = vmul.f32 -1.442695, %v865_v59  ;;  %v866_v2 = vadd.f32 %v853_v46, %v844_v60  ;;  %v846_v3 = vadd.f32 %v845_v0, %v792_v63 }
 0x133   : > { %1623 = vpow2.f32 %v1440_v1  ;;  %v1441_v5 = vmul.f32 -1.442695, %v866_v2  ;;  %v867_v6 = vadd.f32 %v857_v35, %v846_v3  ;;  %v952_v54 = vpop.permute.xlu0 %951 }
 0x134   : > { %1625 = vpow2.f32 %v1439_v62  ;;  %v947_v59 = vpop.permute.xlu1 %946 }
 0x135   : > { %1627 = vpow2.f32 %v1441_v5  ;;  %v1442_v8 = vmul.f32 -1.442695, %v867_v6 }
 0x136   : > { %1629 = vpow2.f32 %v1437_v4 }
 0x137   : > { %1631 = vpow2.f32 %v1442_v8 }
 0x138   : > { %1633 = vpow2.f32 %v1435_v7  ;;  %v942_v7 = vpop.permute.xlu0 %941 }
 0x13c   : > { %v1620_v9 = vpop.eup %1619 }
 0x13d   : > { %v1622_v10 = vpop.eup %1621  ;;  %v895_v12 = vadd.f32 1.0, %v1620_v9 }
 0x13e   : > { %v893_v22 = vadd.f32 1.0, %v1622_v10 }
 0x13f   : > { %1635 = vrcp.f32 %v895_v12 }
 0x140   : > { %v1624_v11 = vpop.eup %1623 }
 0x141   : > { %v1626_v13 = vpop.eup %1625  ;;  %v897_v14 = vadd.f32 1.0, %v1624_v11 }
 0x142   : > { %v1628_v15 = vpop.eup %1627  ;;  %v896_v20 = vadd.f32 1.0, %v1626_v13  ;;  %v937_v13 = vpop.permute.xlu1 %936 }
 0x143   : > { %v1630_v17 = vpop.eup %1629  ;;  %v898_v18 = vadd.f32 1.0, %v1628_v15  ;;  %1637 = vrcp.f32 %v897_v14 }
 0x144   : > { %v1632_v19 = vpop.eup %1631  ;;  %v894_v24 = vadd.f32 1.0, %v1630_v17 }
 0x145   : > { %v1634_v21 = vpop.eup %1633  ;;  %v899_v23 = vadd.f32 1.0, %v1632_v19  ;;  %1639 = vrcp.f32 %v898_v18 }
 0x146   : > { %v892_v25 = vadd.f32 1.0, %v1634_v21 }
 0x147   : > { %1641 = vrcp.f32 %v899_v23 }
 0x148   : > { %1643 = vrcp.f32 %v896_v20 }
 0x149   : > { %1645 = vrcp.f32 %v893_v22 }
 0x14a   : > { %1647 = vrcp.f32 %v894_v24 }
 0x14b   : > { %1649 = vrcp.f32 %v892_v25 }
 0x14c   : > { %v1636_v26 = vpop.eup %1635 }
 0x150   : > { %v1638_v27 = vpop.eup %1637 }
 0x152   : > { %v1640_v28 = vpop.eup %1639 }
 0x154   : > { %v1642_v29 = vpop.eup %1641 }
 0x155   : > { %v1644_v30 = vpop.eup %1643  ;;  %v919_v31 = vpack.c.bf16 %v1642_v29, %v1638_v27 }
 0x156   : > { %v1646_v32 = vpop.eup %1645  ;;  %v918_v33 = vpack.c.bf16 %v1640_v28, %v1644_v30 }
 0x157   : > { %v1648_v34 = vpop.eup %1647  ;;  %1012 = vmatprep.subr.bf16.mxu0 %v919_v31  ;;  %v917_v35 = vpack.c.bf16 %v1636_v26, %v1646_v32 }
 0x158   : > { %1013 = vmatpush1.bf16.msra.mxu0 %v918_v33  ;;  %v1650_v36 = vpop.eup %1649 }
 0x159   : > { %1014 = vmatprep.subr.bf16.mxu0 %v917_v35  ;;  %v916_v37 = vpack.c.bf16 %v1648_v34, %v1650_v36 }
 0x15c   : > { %1015 = vmatpush1.bf16.msra.mxu0 %v916_v37 }
 0x15f   : > { %1447 = vmatmul.mubr.msk.bf16.vlgmr.msra.gmra.mxu0 %vm987_vm0, %v1614_v38 }
 0x160   : > { %1042 = vmatprep.mubr.bf16.mxu0 %v1747_v16 }
 0x167   : > { %1448 = vmatmul.mubr.msk.bf16.gmra.mxu0 %vm987_vm0, %v1615_v39 }
 0x168   : > { %1052 = vmatprep.mubr.bf16.mxu0 %v1747_v16 }
 0x16f   : > { %1449 = vmatmul.mubr.msk.bf16.gmra.mxu0 %vm987_vm0, %v1616_v40 }
 0x170   : > { %1062 = vmatprep.mubr.bf16.mxu0 %v1747_v16 }
 0x177   : > { %1450 = vmatmul.mubr.msk.bf16.gmra.mxu0 %vm987_vm0, %v1617_v41 }
 0x21f   : > { %v1034_v42 = vpop.f32.mrf.mxu0 }
 0x220   : > { %v1035_v24 = vadd.f32 %v1034_v42, %v937_v13 }
 0x221   : > { %v1036_v43 = vpop.f32.mrf.mxu0 }
 0x222   : > { %v1037_v18 = vadd.f32 %v1036_v43, %v937_v13  ;;  %v1451_v28 = vmul.f32 -1.442695, %v1035_v24 }
 0x223   : > { %v1038_v44 = vpop.f32.mrf.mxu0 }
 0x224   : > { %v1039_v21 = vadd.f32 %v1038_v44, %v942_v7  ;;  %v1452_v26 = vmul.f32 -1.442695, %v1037_v18 }
 0x225   : > { %v1040_v46 = vpop.f32.mrf.mxu0 }
 0x226   : > { %v1041_v11 = vadd.f32 %v1040_v46, %v942_v7  ;;  %v1453_v27 = vmul.f32 -1.442695, %v1039_v21 }
 0x227   : > { %v1044_v47 = vpop.f32.mrf.mxu0 }
 0x228   : > { %v1045_v14 = vadd.f32 %v1044_v47, %v947_v59  ;;  %v1454_v23 = vmul.f32 -1.442695, %v1041_v11 }
 0x229   : > { %v1046_v48 = vpop.f32.mrf.mxu0 }
 0x22a   : > { %v1047_v4 = vadd.f32 %v1046_v48, %v947_v59  ;;  %v1455_v25 = vmul.f32 -1.442695, %v1045_v14 }
 0x22b   : > { %v1048_v50 = vpop.f32.mrf.mxu0 }
 0x22c   : > { %v1049_v5 = vadd.f32 %v1048_v50, %v952_v54  ;;  %v1456_v19 = vmul.f32 -1.442695, %v1047_v4 }
 0x22d   : > { %v1050_v51 = vpop.f32.mrf.mxu0 }
 0x22e   : > { %v1051_v16 = vadd.f32 %v1050_v51, %v952_v54  ;;  %v1457_v22 = vmul.f32 -1.442695, %v1049_v5 }
 0x22f   : > { %v1054_v52 = vpop.f32.mrf.mxu0 }
 0x230   : > { %v1458_v60 = vmul.f32 -1.442695, %v1051_v16  ;;  %v1055_v0 = vadd.f32 %v1054_v52, %v957_v49 }
 0x231   : > { %v1056_v55 = vpop.f32.mrf.mxu0 }
 0x232   : > { %v1057_v57 = vadd.f32 %v1056_v55, %v957_v49  ;;  %1651 = vpow2.f32 %v1458_v60  ;;  %v1459_v15 = vmul.f32 -1.442695, %v1055_v0 }
 0x233   : > { %v1058_v56 = vpop.f32.mrf.mxu0 }
 0x234   : > { %v1059_v61 = vadd.f32 %v1058_v56, %v962_v53  ;;  %v1460_v1 = vmul.f32 -1.442695, %v1057_v57 }
 0x235   : > { %v1060_v58 = vpop.f32.mrf.mxu0 }
 0x236   : > { %v1061_v62 = vadd.f32 %v1060_v58, %v962_v53  ;;  %v1461_v8 = vmul.f32 -1.442695, %v1059_v61 }
 0x237   : > { %v1064_v63 = vpop.f32.mrf.mxu0 }
 0x238   : > { %v1462_v2 = vmul.f32 -1.442695, %v1061_v62  ;;  %v1065_v3 = vadd.f32 %v1064_v63, %v967_v45 }
 0x239   : > { %v1066_v6 = vpop.f32.mrf.mxu0 }
 0x23a   : > { %v1463_v9 = vmul.f32 -1.442695, %v1065_v3  ;;  %v1067_v10 = vadd.f32 %v1066_v6, %v967_v45  ;;  %1653 = vpow2.f32 %v1462_v2 }
 0x23b   : > { %v1068_v12 = vpop.f32.mrf.mxu0  ;;  %1655 = vpow2.f32 %v1460_v1 }
 0x23c   : > { %v1464_v17 = vmul.f32 -1.442695, %v1067_v10  ;;  %1657 = vpow2.f32 %v1463_v9 }
 0x23d   : > { %v1069_v20 = vpop.f32.mrf.mxu0  ;;  %1659 = vpow2.f32 %v1461_v8 }
 0x23e   : > { %1661 = vpow2.f32 %v1464_v17  ;;  %v1170_v17 = vpop.permute.xlu1 %1169 }
 0x23f   : > { %1663 = vpow2.f32 %v1459_v15  ;;  %v1652_v29 = vpop.eup %1651  ;;  %v1618_v15 = vld [vmem:[%s2111_s5] sm:$0xff]  }
 0x240   : > { %1665 = vpow2.f32 %v1456_v19  ;;  %v1120_v43 = vadd.f32 1.0, %v1652_v29 }
 0x241   : > { %1667 = vpow2.f32 %v1457_v22 }
 0x242   : > { %1669 = vpow2.f32 %v1454_v23  ;;  %v1175_v23 = vpop.permute.xlu0 %1174 }
 0x243   : > { %1671 = vpow2.f32 %v1455_v25 }
 0x244   : > { %1673 = vpow2.f32 %v1452_v26 }
 0x245   : > { %1675 = vpow2.f32 %v1453_v27 }
 0x246   : > { %1677 = vpow2.f32 %v1451_v28 }
 0x247   : > { %v1654_v30 = vpop.eup %1653 }
 0x248   : > { %v1656_v31 = vpop.eup %1655  ;;  %v1124_v33 = vadd.f32 1.0, %v1654_v30 }
 0x249   : > { %v1658_v32 = vpop.eup %1657  ;;  %v1122_v38 = vadd.f32 1.0, %v1656_v31 }
 0x24a   : > { %v1660_v34 = vpop.eup %1659  ;;  %v1125_v35 = vadd.f32 1.0, %v1658_v32 }
 0x24b   : > { %v1662_v36 = vpop.eup %1661  ;;  %v1123_v41 = vadd.f32 1.0, %v1660_v34 }
 0x24c   : > { %v1664_v37 = vpop.eup %1663  ;;  %1679 = vrcp.f32 %v1125_v35  ;;  %v1126_v39 = vadd.f32 1.0, %v1662_v36 }
 0x24d   : > { %v1666_v40 = vpop.eup %1665  ;;  %1681 = vrcp.f32 %v1124_v33  ;;  %v1121_v45 = vadd.f32 1.0, %v1664_v37 }
 0x24e   : > { %v1668_v42 = vpop.eup %1667  ;;  %1683 = vrcp.f32 %v1126_v39  ;;  %v1118_v47 = vadd.f32 1.0, %v1666_v40 }
 0x24f   : > { %v1670_v44 = vpop.eup %1669  ;;  %1685 = vrcp.f32 %v1122_v38  ;;  %v1119_v49 = vadd.f32 1.0, %v1668_v42 }
 0x250   : > { %v1672_v46 = vpop.eup %1671  ;;  %1687 = vrcp.f32 %v1123_v41  ;;  %v1116_v51 = vadd.f32 1.0, %v1670_v44 }
 0x251   : > { %v1674_v48 = vpop.eup %1673  ;;  %1689 = vrcp.f32 %v1120_v43  ;;  %v1117_v52 = vadd.f32 1.0, %v1672_v46 }
 0x252   : > { %v1676_v50 = vpop.eup %1675  ;;  %1691 = vrcp.f32 %v1121_v45  ;;  %v1114_v54 = vadd.f32 1.0, %v1674_v48 }
 0x253   : > { %v1678_v53 = vpop.eup %1677  ;;  %1693 = vrcp.f32 %v1118_v47  ;;  %v1115_v55 = vadd.f32 1.0, %v1676_v50 }
 0x254   : > { %1695 = vrcp.f32 %v1119_v49  ;;  %v1113_v16 = vadd.f32 1.0, %v1678_v53 }
 0x255   : > { %1697 = vrcp.f32 %v1116_v51 }
 0x256   : > { %1699 = vrcp.f32 %v1117_v52 }
 0x257   : > { %1701 = vrcp.f32 %v1114_v54 }
 0x258   : > { %1703 = vrcp.f32 %v1115_v55 }
 0x259   : > { %v1680_v56 = vpop.eup %1679  ;;  %1705 = vrcp.f32 %v1113_v16 }
 0x25a   : > { %v1682_v57 = vpop.eup %1681  ;;  %v1161_v58 = vpack.c.bf16 %v1680_v56, %v1680_v56 }
 0x25b   : > { %v1684_v59 = vpop.eup %1683 }
 0x25c   : > { %v1162_v60 = vpack.c.bf16 %v1684_v59, %v1684_v59  ;;  %v1686_v61 = vpop.eup %1685  ;;  %v1188_v63 = vsel %vm1186_vm1, %v1161_v58, 0 }
 0x25d   : > { %v1688_v62 = vpop.eup %1687  ;;  %v1160_v0 = vpack.c.bf16 %v1682_v57, %v1686_v61 }
 0x25e   : > { %1466 = vmatprep.subr.msk.bf16.mxu1 %vm1186_vm1, %v1162_v60  ;;  %v1690_v1 = vpop.eup %1689 }
 0x25f   : > { %1202 = vmatpush1.bf16.msra.mxu1 %v1188_v63  ;;  %v1692_v2 = vpop.eup %1691 }
 0x260   : > { %1203 = vmatprep.subr.bf16.mxu1 %v1160_v0  ;;  %v1694_v3 = vpop.eup %1693  ;;  %v1159_v4 = vpack.c.bf16 %v1688_v62, %v1692_v2 }
 0x261   : > { %v1696_v5 = vpop.eup %1695  ;;  %v1158_v6 = vpack.c.bf16 %v1690_v1, %v1694_v3 }
 0x262   : > { %v1698_v7 = vpop.eup %1697 }
 0x263   : > { %1204 = vmatpush1.bf16.msra.mxu1 %v1159_v4  ;;  %v1700_v8 = vpop.eup %1699 }
 0x264   : > { %1205 = vmatprep.subr.bf16.mxu1 %v1158_v6  ;;  %v1702_v9 = vpop.eup %1701  ;;  %v1157_v10 = vpack.c.bf16 %v1696_v5, %v1700_v8 }
 0x265   : > { %v1704_v11 = vpop.eup %1703  ;;  %v1156_v12 = vpack.c.bf16 %v1698_v7, %v1702_v9 }
 0x266   : > { %v1706_v13 = vpop.eup %1705 }
 0x267   : > { %1206 = vmatpush1.bf16.msra.mxu1 %v1157_v10  ;;  %v1155_v14 = vpack.c.bf16 %v1704_v11, %v1706_v13 }
 0x268   : > { %1207 = vmatprep.subr.bf16.mxu1 %v1156_v12 }
 0x26b   : > { %1208 = vmatpush1.bf16.msra.mxu1 %v1155_v14 }
 0x26e   : > { %1467 = vmatmul.mubr.msk.bf16.vlgmr.msra.gmra.mxu1 %vm1182_vm2, %v1618_v15 }
 0x32e   : > { %v1227_v18 = vpop.f32.mrf.mxu1 }
 0x32f   : > { %v1228_v19 = vadd.f32 %v1227_v18, %v1170_v17 }
 0x330   : > { %v1229_v20 = vpop.f32.mrf.mxu1 }
 0x331   : > { %v1468_v21 = vmul.f32 -1.442695, %v1228_v19  ;;  %v1230_v22 = vadd.f32 %v1229_v20, %v1170_v17 }
 0x332   : > { %v1231_v24 = vpop.f32.mrf.mxu1 }
 0x333   : > { %1707 = vpow2.f32 %v1468_v21  ;;  %v1469_v25 = vmul.f32 -1.442695, %v1230_v22  ;;  %v1232_v26 = vadd.f32 %v1231_v24, %v1175_v23 }
 0x334   : > { %v1233_v27 = vpop.f32.mrf.mxu1 }
 0x335   : > { %1709 = vpow2.f32 %v1469_v25  ;;  %v1470_v28 = vmul.f32 -1.442695, %v1232_v26  ;;  %v1234_v29 = vadd.f32 %v1233_v27, %v1175_v23 }
 0x337   : > { %1711 = vpow2.f32 %v1470_v28  ;;  %v1471_v30 = vmul.f32 -1.442695, %v1234_v29 }
 0x339   : > { %1713 = vpow2.f32 %v1471_v30 }
 0x340   : > { %v1708_v31 = vpop.eup %1707 }
 0x341   : > { %v1248_v32 = vadd.f32 1.0, %v1708_v31 }
 0x342   : > { %v1710_v33 = vpop.eup %1709 }
 0x343   : > { %1715 = vrcp.f32 %v1248_v32  ;;  %v1249_v34 = vadd.f32 1.0, %v1710_v33 }
 0x344   : > { %v1712_v35 = vpop.eup %1711 }
 0x345   : > { %1717 = vrcp.f32 %v1249_v34  ;;  %v1250_v36 = vadd.f32 1.0, %v1712_v35 }
 0x346   : > { %v1714_v37 = vpop.eup %1713 }
 0x347   : > { %1719 = vrcp.f32 %v1250_v36  ;;  %v1251_v38 = vadd.f32 1.0, %v1714_v37 }
 0x349   : > { %1721 = vrcp.f32 %v1251_v38 }
 0x350   : > { %v1716_v39 = vpop.eup %1715 }
 0x351   : > { %1260 = vst [vmem:[%s306_s11] sm:$0xff] %v1716_v39 }
 0x352   : > { %v1718_v40 = vpop.eup %1717 }
 0x353   : > { %1261 = vst [vmem:[%s306_s11 + $0x8] sm:$0xff] %v1718_v40  ;;  %1270 = sbr.rel (!%p1818_p5) target bundleno = 864 (0x360), region = 75 }
 0x354   : > { %v1720_v41 = vpop.eup %1719 }
 0x355   : > { %1262 = vst [vmem:[%s306_s11 + $0x10] sm:$0xff] %v1720_v41 }
 0x356   : > { %v1722_v42 = vpop.eup %1721 }
 0x357   : > { %1263 = vst [vmem:[%s306_s11 + $0x18] sm:$0xff] %v1722_v42 }
 0x358   : > { %v1286_v43 = vld [vmem:[%s306_s11] sm:$0xff] }
 0x359   : > { %1287 = vst [vmem:[%s1273_s12] sm:$0xff] %v1286_v43 }
 0x35a   : > { %v1288_v44 = vld [vmem:[%s306_s11 + $0x8] sm:$0xff] }
 0x35b   : > { %1289 = vst [vmem:[%s1273_s12 + $0x8] sm:$0xff] %v1288_v44 }
 0x35c   : > { %v1290_v45 = vld [vmem:[%s306_s11 + $0x10] sm:$0xff] }
 0x35d   : > { %1291 = vst [vmem:[%s1273_s12 + $0x80] sm:$0xff] %v1290_v45 }
 0x35e   : > { %v1292_v46 = vld [vmem:[%s306_s11 + $0x18] sm:$0xff] }
 0x35f   : > { %1293 = vst [vmem:[%s1273_s12 + $0x88] sm:$0xff] %v1292_v46 }
 0x360 PF: > { %p14_p10 = scmp.ge.s32.totalorder %s1805_s28, 10   ;;  %s2115_s24 = smov %s1741_s25 }
 0x361   : > { %s2116_s25 = smov %s1816_s8  ;;  %s2117_s26 = smov %s1805_s28 }
 0x362   :  { %16 = sbr.rel (!%p14_p10) target bundleno = 2 (0x2), region = 129 }

</bundles_post_ra>
